<compile_context>
chip_gen: v7x
topology: tpu7x:2x2x1
jax: 0.10.0
libtpu: 0.0.40
codegen_flags: <defaults>
</compile_context>

<pallas_src>
import functools
import math

import jax
import jax.numpy as jnp
from jax.experimental import pallas as pl
from jax.experimental.pallas import tpu as pltpu


# ----------------------------------------------------------------------------
# Synthetic "Args" (small, consistent with the module)
# ----------------------------------------------------------------------------
ARGS = dict(
    L=4,      # number of grid levels
    F=4,      # features per grid level
    f=2,      # number of direction frequencies
    D=3,      # point / direction dimensionality
    M=16,     # samples per ray
    IR=8,     # I*R  (number of rays)
)

_LANE = 128


def _round_up(x, m):
    return (x + m - 1) // m * m


# ----------------------------------------------------------------------------
# Encodings (glue, plain JAX)
# ----------------------------------------------------------------------------
# TODO(synk): GridTable class was not provided in the reference; it is
# implemented here as a deterministic dense trilinear-interpolated feature
# grid per level (F features, resolution 4 * 2**level).
def grid_table_forward(x, grid):
    """x: (N,3) in [0,1); grid: (R+1, R+1, R+1, F) -> (N, F)."""
    R = grid.shape[0] - 1
    xf = jnp.clip(x, 0.0, 1.0) * R
    x0 = jnp.clip(jnp.floor(xf).astype(jnp.int32), 0, R - 1)
    w = xf - x0.astype(jnp.float32)
    out = jnp.zeros((x.shape[0], grid.shape[-1]), jnp.float32)
    for dx in (0, 1):
        for dy in (0, 1):
            for dz in (0, 1):
                corner = grid[x0[:, 0] + dx, x0[:, 1] + dy, x0[:, 2] + dz]
                wt = (
                    (w[:, 0] if dx else 1.0 - w[:, 0])
                    * (w[:, 1] if dy else 1.0 - w[:, 1])
                    * (w[:, 2] if dz else 1.0 - w[:, 2])
                )
                out = out + corner * wt[:, None]
    return out


def encode_position(X, grids):
    return jnp.concatenate(
        [grid_table_forward(X, g).astype(jnp.float32) for g in grids], axis=1
    )


def encode_direction(D, f):
    parts = []
    for i in range(f):
        parts.append(jnp.sin((2.0 ** i) * jnp.pi * D))
        parts.append(jnp.cos((2.0 ** i) * jnp.pi * D))
    return jnp.concatenate(parts, axis=1).astype(jnp.float32)


# ----------------------------------------------------------------------------
# Pallas MLP kernel
# ----------------------------------------------------------------------------
def map_mlp_kernel(xe_ref, dc1_ref, w1_ref, w2_ref, c1h_ref, c2_ref, c3_ref,
                   b_ref, out_ref):
    wdt = w1_ref.dtype                                  # MXU input dtype (bf16/f32)
    xin = xe_ref[...]                                   # (tm, LF) streamed rows

    # density_lin1 + relu
    h1 = jnp.dot(xin, w1_ref[...], preferred_element_type=jnp.float32)
    h1 = jnp.maximum(h1 + b_ref[0:1, :], 0.0)           # (tm, 64)  f32 elementwise

    # density_lin2 + sigmoid
    h2 = jnp.dot(h1.astype(wdt), w2_ref[...], preferred_element_type=jnp.float32)
    h2 = jax.nn.sigmoid(h2 + b_ref[1:2, 0:16])          # (tm, 16)  f32

    # trunc_exp forward pass == exp (custom backward only clips gradients)
    density = jnp.exp(h2[:, 0:1])                       # (tm, 1)

    # colour_lin1:
    #   geo part: c1h row 0 is zero so h2 @ c1h == h2[:, 1:] @ C1g (no
    #             unaligned lane slice, no lane concat).
    #   dir part: dc1 = dir_enc @ C1d is a tiny (IR, 64) VMEM-resident table;
    #             the torch `.repeat(M, 1)` is reconstructed here by tiling
    #             along sublanes (tile rows are IR-aligned by construction).
    dirs = dc1_ref[...]
    reps = xe_ref.shape[0] // dirs.shape[0]
    if reps > 1:
        dirs = jnp.tile(dirs, (reps, 1))                # (tm, 64) f32
    c1 = jnp.dot(h2.astype(wdt), c1h_ref[...], preferred_element_type=jnp.float32)
    c1 = jnp.maximum(c1 + dirs + b_ref[2:3, :], 0.0)    # (tm, 64)

    c2 = jnp.dot(c1.astype(wdt), c2_ref[...], preferred_element_type=jnp.float32)
    c2 = jnp.maximum(c2 + b_ref[3:4, :], 0.0)           # (tm, 64)

    c3 = jnp.dot(c2.astype(wdt), c3_ref[...], preferred_element_type=jnp.float32)
    colour = jax.nn.sigmoid(c3 + b_ref[4:5, 0:3])       # (tm, 3)

    # Two direct narrow stores; keep the 4-wide output (padding to 128 lanes
    # would 32x the writeback traffic).
    out_ref[:, 0:1] = density
    out_ref[:, 1:4] = colour


# ----------------------------------------------------------------------------
# Tile / VMEM selection (per-generation)
# ----------------------------------------------------------------------------
def _vmem_capacity_bytes():
    try:
        return int(pltpu.get_tpu_info().vmem_capacity_bytes)
    except Exception:
        return 64 * 1024 * 1024            # conservative fallback (v7x per-TC)


def _per_row_vmem_bytes(stream_dtype):
    ib = jnp.dtype(stream_dtype).itemsize
    # Double-buffered lane-padded streamed input + output blocks plus ~6
    # lane-padded f32 intermediates live per row block (generous estimate).
    return _LANE * (2 * ib + 2 * 4 + 6 * 4)


def mlp_pallas(xe, dc1, wp, *, tm=8192):
    """xe: (N, LF) streamed rows; dc1: (IR, 64) f32 per-ray dir term of colour_lin1."""
    N, LF = xe.shape
    IR = dc1.shape[0]

    # Row granule: 16 for bf16 sublane packing, and a multiple of IR so the
    # M-fold direction repeat is tile-aligned (dc1 stays VMEM-resident).
    granule = 16 * IR // math.gcd(16, IR)
    resident_dirs = granule <= 2048
    if not resident_dirs:
        granule = 16                        # fall back to streaming dc1 rows

    cap = _vmem_capacity_bytes()
    row_bytes = _per_row_vmem_bytes(xe.dtype)
    tm_cap = max(granule, (int(cap * 0.8) // row_bytes) // granule * granule)
    tm_eff = max(granule,
                 min(_round_up(tm, granule), tm_cap, _round_up(N, granule)))
    # v7x megacore: ensure big problems give >=2 grid steps so the "parallel"
    # grid axis can be sharded across both TensorCores.
    if N >= 4096 and -(-N // tm_eff) < 2:
        tm_eff = max(granule, _round_up(-(-N // 2), granule))

    n_pad = _round_up(N, tm_eff)
    if n_pad != N:
        xe = jnp.pad(xe, ((0, n_pad - N), (0, 0)))
    grid = n_pad // tm_eff

    if resident_dirs:
        dc1_op = dc1                                            # (IR, 64) resident
        dc1_spec = pl.BlockSpec(dc1.shape, lambda i: (0, 0))
    else:
        dc1_op = jnp.pad(jnp.tile(dc1, (N // IR, 1)), ((0, n_pad - N), (0, 0)))
        dc1_spec = pl.BlockSpec((tm_eff, 64), lambda i: (i, 0))

    rows = lambda i: (i, 0)
    full = lambda i: (0, 0)
    weights = (wp["w1"], wp["w2"], wp["c1h"], wp["c2"], wp["c3"], wp["bias"])

    flops_per_row = 2 * (LF * 64 + 64 * 16 + 16 * 64 + 64 * 64 + 64 * 3)
    cost = pl.CostEstimate(
        flops=n_pad * flops_per_row,
        transcendentals=n_pad * 20,
        bytes_accessed=n_pad * (LF * jnp.dtype(xe.dtype).itemsize + 4 * 4)
        + sum(int(w.size) * jnp.dtype(w.dtype).itemsize for w in weights),
    )

    # Raise the scoped VMEM limit explicitly (covers v5e's 16 MiB default),
    # but never above ~90% of the chip's physical per-core VMEM (v7x: 64 MiB).
    vmem_limit = int(min(cap * 0.9,
                         max(32 << 20, tm_eff * row_bytes + (4 << 20))))

    out = pl.pallas_call(
        map_mlp_kernel,
        out_shape=jax.ShapeDtypeStruct((n_pad, 4), jnp.float32),
        grid=(grid,),
        in_specs=[pl.BlockSpec((tm_eff, LF), rows), dc1_spec]
        + [pl.BlockSpec(w.shape, full) for w in weights],
        out_specs=pl.BlockSpec((tm_eff, 4), rows),
        compiler_params=pltpu.CompilerParams(
            dimension_semantics=("parallel",),
            vmem_limit_bytes=vmem_limit),
        cost_estimate=cost,
        # TODO(synk): sweep pipeline_mode=pl.Buffered(3) on the xe spec only
        # if xprof shows exposed input DMA at large tm (v6e).
    )(xe, dc1_op, *weights)
    return out[:N]


# ----------------------------------------------------------------------------
# Parameter init (deterministic, PyTorch-Linear-style uniform) + packing
# ----------------------------------------------------------------------------
def init_linear(key, in_f, out_f):
    kw, kb = jax.random.split(key)
    bound = 1.0 / jnp.sqrt(in_f)
    w = jax.random.uniform(kw, (in_f, out_f), jnp.float32, -bound, bound)
    b = jax.random.uniform(kb, (1, out_f), jnp.float32, -bound, bound)
    return w, b


def init_params(key, args):
    L, F, f, D = args["L"], args["F"], args["f"], args["D"]
    keys = jax.random.split(key, 6 + L)
    grids = []
    for lvl in range(L):
        R = 4 * (2 ** lvl)
        grids.append(
            0.1 * jax.random.normal(keys[lvl], (R + 1, R + 1, R + 1, F), jnp.float32)
        )
    w1, b1 = init_linear(keys[L + 0], L * F, 64)        # density_lin1
    w2, b2 = init_linear(keys[L + 1], 64, 16)           # density_lin2
    # colour_lin1 is declared Linear(16 + 2*f*D, 64) in __init__ but only
    # receives 15 + 2*f*D features (geo_features drops column 0).
    # TODO(synk): original module has this off-by-one; we use the first
    # 15 + 2*f*D input rows of the declared weight.
    c1_full, cb1 = init_linear(keys[L + 2], 16 + 2 * f * D, 64)
    c1 = c1_full[: 15 + 2 * f * D]
    c2, cb2 = init_linear(keys[L + 3], 64, 64)          # colour_lin2
    c3, cb3 = init_linear(keys[L + 4], 64, 3)           # colour_lin3
    return dict(
        grids=grids,
        w1=w1, b1=b1, w2=w2, b2=b2,
        c1g=c1[:15], c1d=c1[15:], cb1=cb1,
        c2=c2, cb2=cb2, c3=c3, cb3=cb3,
    )


def pack_params(p, compute_dtype):
    """Fuse the MLP weights/biases into 6 kernel operands (bias stays f32)."""
    c1h = jnp.zeros((16, 64), jnp.float32).at[1:16].set(p["c1g"])
    bias = jnp.zeros((8, 64), jnp.float32)
    bias = bias.at[0, :].set(p["b1"][0])
    bias = bias.at[1, :16].set(p["b2"][0])
    bias = bias.at[2, :].set(p["cb1"][0])
    bias = bias.at[3, :].set(p["cb2"][0])
    bias = bias.at[4, :3].set(p["cb3"][0])
    cast = lambda a: a.astype(compute_dtype)
    return dict(w1=cast(p["w1"]), w2=cast(p["w2"]), c1h=cast(c1h),
                c2=cast(p["c2"]), c3=cast(p["c3"]), bias=bias)


# ----------------------------------------------------------------------------
# Full forward (matches Map.forward semantics)
# ----------------------------------------------------------------------------
@functools.partial(jax.jit, static_argnames=("M", "f", "compute_dtype", "tm"))
def map_forward(X, Dirs, params, *, M, f, compute_dtype=jnp.bfloat16, tm=8192):
    xe = encode_position(X, params["grids"])             # (N, L*F)   f32
    de = encode_direction(Dirs, f)                       # (IR, 2fD)  f32
    assert xe.shape[0] == de.shape[0] * M                # N = IR * M by construction
    # Direction contribution of colour_lin1 precomputed ONCE per ray: tiny
    # (IR, 2fD) @ (2fD, 64).  The kernel rebuilds the M-fold repeat in VMEM,
    # so no (N, 2fD) direction array is ever written to / streamed from HBM.
    dc1 = de @ params["c1d"]                             # (IR, 64) f32
    wp = pack_params(params, compute_dtype)
    # TODO(synk): for bit-exact f32 matmul semantics vs the torch module pass
    # precision=jax.lax.Precision.HIGHEST in the kernel dots; default is used
    # here (validated to 1e-4 below).
    out = mlp_pallas(xe.astype(compute_dtype), dc1, wp, tm=tm)   # (N, 4) f32
    return out[:, 0], out[:, 1:4]


def reference_forward(X, Dirs, p, *, M, f):
    xe = encode_position(X, p["grids"])
    de = jnp.tile(encode_direction(Dirs, f), (M, 1))
    h = jnp.maximum(xe @ p["w1"] + p["b1"], 0.0)
    h = jax.nn.sigmoid(h @ p["w2"] + p["b2"])
    density = jnp.exp(h[:, 0])
    geo = h[:, 1:]
    c = jnp.maximum(geo @ p["c1g"] + de @ p["c1d"] + p["cb1"], 0.0)
    c = jnp.maximum(c @ p["c2"] + p["cb2"], 0.0)
    colour = jax.nn.sigmoid(c @ p["c3"] + p["cb3"])
    return density, colour


if __name__ == "__main__":
    args = ARGS
    key = jax.random.PRNGKey(0)
    kx, kd, kp = jax.random.split(key, 3)

    N = args["IR"] * args["M"]                           # 128 points
    X = jax.random.uniform(kx, (N, args["D"]), jnp.float32)          # points in [0,1)
    Dv = jax.random.normal(kd, (args["IR"], args["D"]), jnp.float32)
    Dv = Dv / jnp.linalg.norm(Dv, axis=1, keepdims=True)              # unit directions

    params = init_params(kp, args)

    # Default path: bf16 streaming / MXU inputs, f32 accumulate + f32 elementwise.
    dbf, cbf = map_forward(X, Dv, params, M=args["M"], f=args["f"])
    dbf, cbf = jax.block_until_ready((dbf, cbf))

    # f32 path (closest to the torch module's math).
    d32, c32 = map_forward(X, Dv, params, M=args["M"], f=args["f"],
                           compute_dtype=jnp.float32)
    d32, c32 = jax.block_until_ready((d32, c32))

    d_ref, c_ref = reference_forward(X, Dv, params, M=args["M"], f=args["f"])

    assert dbf.shape == (N,) and cbf.shape == (N, 3)
    assert d32.shape == (N,) and c32.shape == (N, 3)
    assert jnp.allclose(d32, d_ref, rtol=1e-4, atol=1e-4)
    assert jnp.allclose(c32, c_ref, rtol=1e-4, atol=1e-4)
    assert jnp.allclose(dbf, d_ref, rtol=5e-2, atol=5e-2)
    assert jnp.allclose(cbf, c_ref, rtol=5e-2, atol=5e-2)

    print("KERNEL_OK")
</pallas_src>

<mosaic_0001>
module attributes {stable_mosaic.version = 11 : i64} {
  func.func @map_mlp_kernel(%arg0: i32, %arg1: memref<128x16xbf16, #tpu.memory_space<vmem>>, %arg2: memref<8x64xf32, #tpu.memory_space<vmem>>, %arg3: memref<16x64xbf16, #tpu.memory_space<vmem>>, %arg4: memref<64x16xbf16, #tpu.memory_space<vmem>>, %arg5: memref<16x64xbf16, #tpu.memory_space<vmem>>, %arg6: memref<64x64xbf16, #tpu.memory_space<vmem>>, %arg7: memref<64x3xbf16, #tpu.memory_space<vmem>>, %arg8: memref<8x64xf32, #tpu.memory_space<vmem>>, %arg9: memref<128x4xf32, #tpu.memory_space<vmem>>) attributes {dimension_semantics = [#tpu.dimension_semantics<parallel>], iteration_bounds = array<i64: 1>, scalar_prefetch = 0 : i64, scratch_operands = 0 : i64, tpu.core_type = #tpu.core_type<tc>, window_params = [{transform_indices = @transform_0, window_bounds = array<i64: 128, 16>}, {pipeline_mode = #tpu.pipeline_mode<synchronous>, transform_indices = @transform_1, window_bounds = array<i64: 8, 64>}, {pipeline_mode = #tpu.pipeline_mode<synchronous>, transform_indices = @transform_2, window_bounds = array<i64: 16, 64>}, {pipeline_mode = #tpu.pipeline_mode<synchronous>, transform_indices = @transform_3, window_bounds = array<i64: 64, 16>}, {pipeline_mode = #tpu.pipeline_mode<synchronous>, transform_indices = @transform_4, window_bounds = array<i64: 16, 64>}, {pipeline_mode = #tpu.pipeline_mode<synchronous>, transform_indices = @transform_5, window_bounds = array<i64: 64, 64>}, {pipeline_mode = #tpu.pipeline_mode<synchronous>, transform_indices = @transform_6, window_bounds = array<i64: 64, 3>}, {pipeline_mode = #tpu.pipeline_mode<synchronous>, transform_indices = @transform_7, window_bounds = array<i64: 8, 64>}, {transform_indices = @transform_8, window_bounds = array<i64: 128, 4>}]} {
    %c0 = arith.constant 0 : index
    %c0_0 = arith.constant 0 : index
    %0 = vector.load %arg1[%c0, %c0_0] : memref<128x16xbf16, #tpu.memory_space<vmem>>, vector<128x16xbf16>
    %c0_1 = arith.constant 0 : index
    %c0_2 = arith.constant 0 : index
    %1 = vector.load %arg3[%c0_1, %c0_2] : memref<16x64xbf16, #tpu.memory_space<vmem>>, vector<16x64xbf16>
    %cst = arith.constant dense<0.000000e+00> : vector<128x64xf32>
    %2 = tpu.matmul %0, %1, %cst {dimension_numbers = #tpu.dot_dimension_numbers<[1], [0], [0], [1], [0, 0, 1, 1], [], []>} : vector<128x16xbf16>, vector<16x64xbf16>, vector<128x64xf32> -> vector<128x64xf32>
    %c0_3 = arith.constant 0 : index
    %c0_4 = arith.constant 0 : index
    %3 = vector.load %arg8[%c0_3, %c0_4] : memref<8x64xf32, #tpu.memory_space<vmem>>, vector<1x64xf32>
    %4 = vector.broadcast %3 : vector<1x64xf32> to vector<128x64xf32>
    %5 = arith.addf %2, %4 : vector<128x64xf32>
    %cst_5 = arith.constant 0.000000e+00 : f32
    %6 = vector.broadcast %cst_5 : f32 to vector<128x64xf32>
    %7 = arith.maximumf %5, %6 : vector<128x64xf32>
    %8 = arith.truncf %7 : vector<128x64xf32> to vector<128x64xbf16>
    %c0_6 = arith.constant 0 : index
    %c0_7 = arith.constant 0 : index
    %9 = vector.load %arg4[%c0_6, %c0_7] : memref<64x16xbf16, #tpu.memory_space<vmem>>, vector<64x16xbf16>
    %cst_8 = arith.constant dense<0.000000e+00> : vector<128x16xf32>
    %10 = tpu.matmul %8, %9, %cst_8 {dimension_numbers = #tpu.dot_dimension_numbers<[1], [0], [0], [1], [0, 0, 1, 1], [], []>} : vector<128x64xbf16>, vector<64x16xbf16>, vector<128x16xf32> -> vector<128x16xf32>
    %c1 = arith.constant 1 : index
    %c0_9 = arith.constant 0 : index
    %11 = vector.load %arg8[%c1, %c0_9] : memref<8x64xf32, #tpu.memory_space<vmem>>, vector<1x16xf32>
    %12 = vector.broadcast %11 : vector<1x16xf32> to vector<128x16xf32>
    %13 = arith.addf %10, %12 : vector<128x16xf32>
    %14 = arith.negf %13 : vector<128x16xf32>
    %15 = math.exp %14 : vector<128x16xf32>
    %cst_10 = arith.constant 1.000000e+00 : f32
    %16 = vector.broadcast %cst_10 : f32 to vector<128x16xf32>
    %17 = arith.addf %16, %15 : vector<128x16xf32>
    %18 = arith.divf %16, %17 : vector<128x16xf32>
    %19 = vector.extract_strided_slice %18 {offsets = [0, 0], sizes = [128, 1], strides = [1, 1]} : vector<128x16xf32> to vector<128x1xf32>
    %20 = math.exp %19 : vector<128x1xf32>
    %c0_11 = arith.constant 0 : index
    %c0_12 = arith.constant 0 : index
    %21 = vector.load %arg2[%c0_11, %c0_12] : memref<8x64xf32, #tpu.memory_space<vmem>>, vector<8x64xf32>
    %22 = tpu.concatenate %21, %21, %21, %21, %21, %21, %21, %21, %21, %21, %21, %21, %21, %21, %21, %21 in 0 : vector<8x64xf32>, vector<8x64xf32>, vector<8x64xf32>, vector<8x64xf32>, vector<8x64xf32>, vector<8x64xf32>, vector<8x64xf32>, vector<8x64xf32>, vector<8x64xf32>, vector<8x64xf32>, vector<8x64xf32>, vector<8x64xf32>, vector<8x64xf32>, vector<8x64xf32>, vector<8x64xf32>, vector<8x64xf32> -> vector<128x64xf32>
    %23 = arith.truncf %18 : vector<128x16xf32> to vector<128x16xbf16>
    %c0_13 = arith.constant 0 : index
    %c0_14 = arith.constant 0 : index
    %24 = vector.load %arg5[%c0_13, %c0_14] : memref<16x64xbf16, #tpu.memory_space<vmem>>, vector<16x64xbf16>
    %cst_15 = arith.constant dense<0.000000e+00> : vector<128x64xf32>
    %25 = tpu.matmul %23, %24, %cst_15 {dimension_numbers = #tpu.dot_dimension_numbers<[1], [0], [0], [1], [0, 0, 1, 1], [], []>} : vector<128x16xbf16>, vector<16x64xbf16>, vector<128x64xf32> -> vector<128x64xf32>
    %26 = arith.addf %25, %22 : vector<128x64xf32>
    %c2 = arith.constant 2 : index
    %c0_16 = arith.constant 0 : index
    %27 = vector.load %arg8[%c2, %c0_16] : memref<8x64xf32, #tpu.memory_space<vmem>>, vector<1x64xf32>
    %28 = vector.broadcast %27 : vector<1x64xf32> to vector<128x64xf32>
    %29 = arith.addf %26, %28 : vector<128x64xf32>
    %cst_17 = arith.constant 0.000000e+00 : f32
    %30 = vector.broadcast %cst_17 : f32 to vector<128x64xf32>
    %31 = arith.maximumf %29, %30 : vector<128x64xf32>
    %32 = arith.truncf %31 : vector<128x64xf32> to vector<128x64xbf16>
    %c0_18 = arith.constant 0 : index
    %c0_19 = arith.constant 0 : index
    %33 = vector.load %arg6[%c0_18, %c0_19] : memref<64x64xbf16, #tpu.memory_space<vmem>>, vector<64x64xbf16>
    %cst_20 = arith.constant dense<0.000000e+00> : vector<128x64xf32>
    %34 = tpu.matmul %32, %33, %cst_20 {dimension_numbers = #tpu.dot_dimension_numbers<[1], [0], [0], [1], [0, 0, 1, 1], [], []>} : vector<128x64xbf16>, vector<64x64xbf16>, vector<128x64xf32> -> vector<128x64xf32>
    %c3 = arith.constant 3 : index
    %c0_21 = arith.constant 0 : index
    %35 = vector.load %arg8[%c3, %c0_21] : memref<8x64xf32, #tpu.memory_space<vmem>>, vector<1x64xf32>
    %36 = vector.broadcast %35 : vector<1x64xf32> to vector<128x64xf32>
    %37 = arith.addf %34, %36 : vector<128x64xf32>
    %cst_22 = arith.constant 0.000000e+00 : f32
    %38 = vector.broadcast %cst_22 : f32 to vector<128x64xf32>
    %39 = arith.maximumf %37, %38 : vector<128x64xf32>
    %40 = arith.truncf %39 : vector<128x64xf32> to vector<128x64xbf16>
    %c0_23 = arith.constant 0 : index
    %c0_24 = arith.constant 0 : index
    %41 = vector.load %arg7[%c0_23, %c0_24] : memref<64x3xbf16, #tpu.memory_space<vmem>>, vector<64x3xbf16>
    %cst_25 = arith.constant dense<0.000000e+00> : vector<128x3xf32>
    %42 = tpu.matmul %40, %41, %cst_25 {dimension_numbers = #tpu.dot_dimension_numbers<[1], [0], [0], [1], [0, 0, 1, 1], [], []>} : vector<128x64xbf16>, vector<64x3xbf16>, vector<128x3xf32> -> vector<128x3xf32>
    %c4 = arith.constant 4 : index
    %c0_26 = arith.constant 0 : index
    %43 = vector.load %arg8[%c4, %c0_26] : memref<8x64xf32, #tpu.memory_space<vmem>>, vector<1x3xf32>
    %44 = vector.broadcast %43 : vector<1x3xf32> to vector<128x3xf32>
    %45 = arith.addf %42, %44 : vector<128x3xf32>
    %46 = arith.negf %45 : vector<128x3xf32>
    %47 = math.exp %46 : vector<128x3xf32>
    %cst_27 = arith.constant 1.000000e+00 : f32
    %48 = vector.broadcast %cst_27 : f32 to vector<128x3xf32>
    %49 = arith.addf %48, %47 : vector<128x3xf32>
    %50 = arith.divf %48, %49 : vector<128x3xf32>
    %c0_28 = arith.constant 0 : index
    %c0_29 = arith.constant 0 : index
    %51 = vector.load %arg9[%c0_28, %c0_29] : memref<128x4xf32, #tpu.memory_space<vmem>>, vector<128x1xf32>
    tpu.vector_store %arg9[%c0_28, %c0_29], %20 {strides = array<i32>} : memref<128x4xf32, #tpu.memory_space<vmem>>, vector<128x1xf32>,
    %c0_30 = arith.constant 0 : index
    %c1_31 = arith.constant 1 : index
    %52 = vector.load %arg9[%c0_30, %c1_31] : memref<128x4xf32, #tpu.memory_space<vmem>>, vector<128x3xf32>
    tpu.vector_store %arg9[%c0_30, %c1_31], %50 {strides = array<i32>} : memref<128x4xf32, #tpu.memory_space<vmem>>, vector<128x3xf32>,
    return
  }
  func.func @transform_0(%arg0: i32) -> (i32, i32) {
    %c0_i32 = arith.constant 0 : i32
    %c0_i32_0 = arith.constant 0 : i32
    return %arg0, %c0_i32 : i32, i32
  }
  func.func @transform_1(%arg0: i32) -> (i32, i32) {
    %c0_i32 = arith.constant 0 : i32
    %c0_i32_0 = arith.constant 0 : i32
    %c0_i32_1 = arith.constant 0 : i32
    return %c0_i32, %c0_i32_0 : i32, i32
  }
  func.func @transform_2(%arg0: i32) -> (i32, i32) {
    %c0_i32 = arith.constant 0 : i32
    %c0_i32_0 = arith.constant 0 : i32
    %c0_i32_1 = arith.constant 0 : i32
    return %c0_i32, %c0_i32_0 : i32, i32
  }
  func.func @transform_3(%arg0: i32) -> (i32, i32) {
    %c0_i32 = arith.constant 0 : i32
    %c0_i32_0 = arith.constant 0 : i32
    %c0_i32_1 = arith.constant 0 : i32
    return %c0_i32, %c0_i32_0 : i32, i32
  }
  func.func @transform_4(%arg0: i32) -> (i32, i32) {
    %c0_i32 = arith.constant 0 : i32
    %c0_i32_0 = arith.constant 0 : i32
    %c0_i32_1 = arith.constant 0 : i32
    return %c0_i32, %c0_i32_0 : i32, i32
  }
  func.func @transform_5(%arg0: i32) -> (i32, i32) {
    %c0_i32 = arith.constant 0 : i32
    %c0_i32_0 = arith.constant 0 : i32
    %c0_i32_1 = arith.constant 0 : i32
    return %c0_i32, %c0_i32_0 : i32, i32
  }
  func.func @transform_6(%arg0: i32) -> (i32, i32) {
    %c0_i32 = arith.constant 0 : i32
    %c0_i32_0 = arith.constant 0 : i32
    %c0_i32_1 = arith.constant 0 : i32
    return %c0_i32, %c0_i32_0 : i32, i32
  }
  func.func @transform_7(%arg0: i32) -> (i32, i32) {
    %c0_i32 = arith.constant 0 : i32
    %c0_i32_0 = arith.constant 0 : i32
    %c0_i32_1 = arith.constant 0 : i32
    return %c0_i32, %c0_i32_0 : i32, i32
  }
  func.func @transform_8(%arg0: i32) -> (i32, i32) {
    %c0_i32 = arith.constant 0 : i32
    %c0_i32_0 = arith.constant 0 : i32
    return %arg0, %c0_i32 : i32, i32
  }
}

</mosaic_0001>

<bundles_post_ra>
// kernel: map_forward.1
= control target key start
LH: loop header
LB: loop body
LE: loop exit
PB: predicated region body
PF: predicated region fallthrough
CT: control target
= control target key end

     0   :  { %vm99_vm0 = vcmask 130048   ;;  %vm282_vm1 = vcmask 523264   ;;  %vm1151_vm2 = vcmask 7168   ;;  %vm1232_vm3 = vcmask 31752   ;;  %s2085_s2 = inlined_call_operand.vmem [shape: bf16[16,64], index: 2, kind: input, shape index: {}]   ;;  %s2086_s0 = inlined_call_operand.vmem [shape: bf16[128,16], index: 0, kind: input, shape index: {}]   ;;  %s2087_s3 = inlined_call_operand.vmem [shape: bf16[64,16], index: 3, kind: input, shape index: {}]   ;;  %s2088_s7 = inlined_call_operand.vmem [shape: f32[8,64], index: 7, kind: input, shape index: {}]   ;;  %s2089_s4 = inlined_call_operand.vmem [shape: bf16[16,64], index: 4, kind: input, shape index: {}]   ;;  %s2090_s5 = inlined_call_operand.vmem [shape: bf16[64,64], index: 5, kind: input, shape index: {}]   ;;  %s2091_s8 = inlined_call_operand.vmem [shape: f32[128,4], index: 8, kind: output, shape index: {}]   ;;  %s2092_s6 = inlined_call_operand.vmem [shape: bf16[64,3], index: 6, kind: input, shape index: {}]   ;;  %s2093_s1 = inlined_call_operand.vmem [shape: f32[8,64], index: 1, kind: input, shape index: {}]  }
   0x1   :  { %v1517_v0 = vld [vmem:[%s2085_s2] sm:$0xff]   ;;  %v1519_v2 = vld [vmem:[%s2086_s0 + $0x8] sm:$0xff]   ;;  %v1520_v3 = vld [vmem:[%s2086_s0 + $0x10] sm:$0xff]  }
   0x2   :  { %v1518_v1 = vld [vmem:[%s2086_s0] sm:$0xff]   ;;  %1406 = vmatprep.subr.bf16.mxu0 %v1517_v0  ;;  %1514 = vmatprep.subr.bf16.mxu1 %v1517_v0  ;;  %v1523_v5 = vld [vmem:[%s2086_s0 + $0x28] sm:$0xff]   ;;  %v1524_v6 = vld [vmem:[%s2086_s0 + $0x30] sm:$0xff]  }
   0x3   :  { %1407 = vmatpush3.bf16.msra.mxu0 %v1517_v0  ;;  %1408 = vmatprep.mubr.msk.bf16.mxu0 %vm99_vm0, %v1518_v1  ;;  %v1522_v4 = vld [vmem:[%s2086_s0 + $0x20] sm:$0xff]   ;;  %v1521_v7 = vld [vmem:[%s2086_s0 + $0x18] sm:$0xff]   ;;  %v1527_v9 = vld [vmem:[%s2087_s3 + $0x8] sm:$0xff]  }
   0x4   :  { %1515 = vmatpush3.bf16.msra.mxu1 %v1517_v0  ;;  %1416 = vmatprep.mubr.msk.bf16.mxu1 %vm99_vm0, %v1522_v4  ;;  %v1526_v8 = vld [vmem:[%s2087_s3] sm:$0xff]   ;;  %v1525_v10 = vld [vmem:[%s2086_s0 + $0x38] sm:$0xff]   ;;  %v1528_v11 = vld [vmem:[%s2087_s3 + $0x10] sm:$0xff]  }
   0x5   :  { %1424 = vmatprep.subr.bf16.mxu1 %v1526_v8  ;;  %v1529_v12 = vld [vmem:[%s2087_s3 + $0x18] sm:$0xff]   ;;  %v1253_v13 = vld [vmem:[%s2088_s7] ss:$0 sm:$0xff] }
   0x6   :  { %1409 = vmatmul.mubr.msk.bf16.vlgmr.msra.gmra.mrb[0].mxu0 %vm99_vm0, %v1519_v2 }
   0x7   :  { %1412 = vmatprep.mubr.msk.bf16.mxu0 %vm99_vm0, %v1520_v3  ;;  %1417 = vmatmul.mubr.msk.bf16.vlgmr.msra.gmra.mrb[0].mxu1 %vm99_vm0, %v1523_v5 }
   0x8   :  { %1420 = vmatprep.mubr.msk.bf16.mxu1 %vm99_vm0, %v1524_v6  ;;  %1425 = vmatpush3.bf16.msra.mxu1 %v1526_v8  ;;  %v1530_v6 = vld [vmem:[%s2089_s4] sm:$0xff]   ;;  %v1532_v8 = vld [vmem:[%s2090_s5 + $0x8] sm:$0xff]  }
   0x9   :  { %1426 = vmatprep.subr.bf16.mxu1 %v1527_v9  ;;  %1448 = vmatprep.subr.bf16.mxu0 %v1530_v6 }
   0xa   :  { %1449 = vmatpush3.bf16.msra.mxu0 %v1530_v6 }
   0xc   :  { %1427 = vmatpush3.bf16.msra.mxu1 %v1527_v9  ;;  %v1533_v9 = vld [vmem:[%s2090_s5 + $0x10] sm:$0xff]  }
   0xd   :  { %1428 = vmatprep.subr.bf16.mxu1 %v1528_v11 }
   0xe   :  { %1413 = vmatmul.mubr.msk.bf16.gmra.mrb[4].mxu0 %vm99_vm0, %v1521_v7  ;;  %v1531_v7 = vld [vmem:[%s2090_s5] sm:$0xff]  }
   0xf   :  { %1421 = vmatmul.mubr.msk.bf16.gmra.mrb[4].mxu1 %vm99_vm0, %v1525_v10  ;;  %v1818_v10 = vld [vmem:[%s2088_s7 + $0x1] ss:$0 sm:$0xff] }
  0x10   :  { %1429 = vmatpush3.bf16.msra.mxu1 %v1528_v11 }
  0x11   :  { %1430 = vmatprep.subr.bf16.mxu1 %v1529_v12 }
  0x14   :  { %1431 = vmatpush3.bf16.msra.mxu1 %v1529_v12 }
  0x15   :  { %1466 = vmatprep.subr.bf16.mxu1 %v1531_v7 }
  0xd9   :  { %v1410_v14 = vpop.f32.mrb[0].mxu0 }
  0xda   :  { %v167_v15 = vadd.f32 %v1410_v14, %v1253_v13  ;;  %v158_v16 = vpop.f32.mrb[1].mxu0  ;;  %v1418_v19 = vpop.f32.mrb[0].mxu1 }
  0xdb   :  { %v159_v17 = vadd.f32 %v1253_v13, %v158_v16  ;;  %v1411_v18 = vpop.f32.mrb[2].mxu0  ;;  %v199_v22 = vadd.f32 %v1418_v19, %v1253_v13  ;;  %v190_v23 = vpop.f32.mrb[1].mxu1 }
  0xdc   :  { %v170_v20 = vadd.f32 %v1411_v18, %v1253_v13  ;;  %v161_v21 = vpop.f32.mrb[3].mxu0  ;;  %v191_v25 = vadd.f32 %v1253_v13, %v190_v23  ;;  %v1419_v26 = vpop.f32.mrb[2].mxu1  ;;  %v223_v27 = vmax.f32 %v167_v15, 0.0 }
  0xdd   :  { %v162_v24 = vadd.f32 %v1253_v13, %v161_v21  ;;  %v231_v29 = vmax.f32 %v199_v22, 0.0  ;;  %v202_v30 = vadd.f32 %v1419_v26, %v1253_v13  ;;  %v193_v31 = vpop.f32.mrb[3].mxu1  ;;  %v221_v32 = vmax.f32 %v159_v17, 0.0 }
  0xde   :  { %v224_v28 = vmax.f32 %v170_v20, 0.0  ;;  %v229_v34 = vmax.f32 %v191_v25, 0.0  ;;  %v194_v35 = vadd.f32 %v1253_v13, %v193_v31 }
  0xdf   :  { %v222_v33 = vmax.f32 %v162_v24, 0.0  ;;  %v232_v37 = vmax.f32 %v202_v30, 0.0 }
  0xe0   :  { %v238_v36 = vpack.c.bf16 %v224_v28, %v223_v27  ;;  %v230_v40 = vmax.f32 %v194_v35, 0.0 }
  0xe1   :  { %v237_v38 = vpack.c.bf16 %v222_v33, %v221_v32  ;;  %v1414_v39 = vpop.f32.mrb[4].mxu0  ;;  %v242_v43 = vpack.c.bf16 %v232_v37, %v231_v29 }
  0xe2   :  { %v183_v41 = vadd.f32 %v1414_v39, %v1253_v13  ;;  %v174_v42 = vpop.f32.mrb[5].mxu0  ;;  %v241_v46 = vpack.c.bf16 %v230_v40, %v229_v34  ;;  %v1422_v47 = vpop.f32.mrb[4].mxu1 }
  0xe3   :  { %v175_v44 = vadd.f32 %v1253_v13, %v174_v42  ;;  %v1415_v45 = vpop.f32.mrb[6].mxu0  ;;  %1432 = vmatprep.mubr.msk.bf16.mxu1 %vm282_vm1, %v237_v38  ;;  %v215_v50 = vadd.f32 %v1422_v47, %v1253_v13  ;;  %v206_v51 = vpop.f32.mrb[5].mxu1 }
  0xe4   :  { %v186_v48 = vadd.f32 %v1415_v45, %v1253_v13  ;;  %v177_v49 = vpop.f32.mrb[7].mxu0  ;;  %1433 = vmatmul.mubr.msk.bf16.vlgmr.msra.gmra.mrb[8].mxu1 %vm282_vm1, %v238_v36  ;;  %v207_v53 = vadd.f32 %v1253_v13, %v206_v51  ;;  %v1423_v54 = vpop.f32.mrb[6].mxu1  ;;  %v227_v55 = vmax.f32 %v183_v41, 0.0 }
  0xe5   :  { %v178_v52 = vadd.f32 %v1253_v13, %v177_v49  ;;  %v235_v57 = vmax.f32 %v215_v50, 0.0  ;;  %v218_v58 = vadd.f32 %v1423_v54, %v1253_v13  ;;  %v209_v59 = vpop.f32.mrb[7].mxu1  ;;  %v225_v60 = vmax.f32 %v175_v44, 0.0  ;;  %1467 = vmatpush3.bf16.msra.mxu1 %v1531_v7 }
  0xe6   :  { %v228_v56 = vmax.f32 %v186_v48, 0.0  ;;  %v233_v62 = vmax.f32 %v207_v53, 0.0  ;;  %v210_v63 = vadd.f32 %v1253_v13, %v209_v59  ;;  %1468 = vmatprep.subr.bf16.mxu1 %v1532_v8 }
  0xe7   :  { %v226_v61 = vmax.f32 %v178_v52, 0.0  ;;  %v236_v1 = vmax.f32 %v218_v58, 0.0 }
  0xe8   :  { %v240_v0 = vpack.c.bf16 %v228_v56, %v227_v55  ;;  %v234_v3 = vmax.f32 %v210_v63, 0.0 }
  0xe9   :  { %v239_v2 = vpack.c.bf16 %v226_v61, %v225_v60  ;;  %v244_v4 = vpack.c.bf16 %v236_v1, %v235_v57  ;;  %1469 = vmatpush3.bf16.msra.mxu1 %v1532_v8 }
  0xea   :  { %v243_v5 = vpack.c.bf16 %v234_v3, %v233_v62  ;;  %1470 = vmatprep.subr.bf16.mxu1 %v1533_v9 }
  0xeb   :  { %1436 = vmatprep.mubr.msk.bf16.mxu1 %vm282_vm1, %v239_v2 }
  0xec   :  { %1437 = vmatmul.mubr.msk.bf16.gmra.mrb[12].mxu1 %vm282_vm1, %v240_v0 }
  0xed   :  { %1440 = vmatprep.mubr.msk.bf16.mxu1 %vm282_vm1, %v241_v46  ;;  %1471 = vmatpush3.bf16.msra.mxu1 %v1533_v9 }
  0xf4   :  { %1441 = vmatmul.mubr.msk.bf16.gmra.mrb[16].mxu1 %vm282_vm1, %v242_v43 }
  0xf5   :  { %1444 = vmatprep.mubr.msk.bf16.mxu1 %vm282_vm1, %v243_v5 }
  0xfc   :  { %1445 = vmatmul.mubr.msk.bf16.gmra.mrb[20].mxu1 %vm282_vm1, %v244_v4 }
 0x1b7   :  { %v1434_v11 = vpop.f32.mrb[8].mxu1 }
 0x1b8   :  { %v350_v12 = vadd.f32 %v1434_v11, %v1818_v10  ;;  %v341_v13 = vpop.f32.mrb[9].mxu1 }
 0x1b9   :  { %v342_v14 = vadd.f32 %v1818_v10, %v341_v13  ;;  %v1435_v15 = vpop.f32.mrb[10].mxu1 }
 0x1ba   :  { %v1286_v16 = vmul.f32 -1.442695, %v350_v12  ;;  %v353_v17 = vadd.f32 %v1435_v15, %v1818_v10  ;;  %v344_v18 = vpop.f32.mrb[11].mxu1 }
 0x1bb   :  { %v1284_v19 = vmul.f32 -1.442695, %v342_v14  ;;  %v345_v20 = vadd.f32 %v1818_v10, %v344_v18 }
 0x1bc   :  { %1539 = vpow2.f32 %v1286_v16  ;;  %v1287_v21 = vmul.f32 -1.442695, %v353_v17 }
 0x1bd   :  { %1541 = vpow2.f32 %v1284_v19  ;;  %v1285_v22 = vmul.f32 -1.442695, %v345_v20 }
 0x1be   :  { %1543 = vpow2.f32 %v1287_v21 }
 0x1bf   :  { %1545 = vpow2.f32 %v1285_v22  ;;  %v1438_v23 = vpop.f32.mrb[12].mxu1 }
 0x1c0   :  { %v366_v24 = vadd.f32 %v1438_v23, %v1818_v10  ;;  %v357_v25 = vpop.f32.mrb[13].mxu1 }
 0x1c1   :  { %v358_v26 = vadd.f32 %v1818_v10, %v357_v25  ;;  %v1439_v27 = vpop.f32.mrb[14].mxu1 }
 0x1c2   :  { %v1290_v28 = vmul.f32 -1.442695, %v366_v24  ;;  %v369_v29 = vadd.f32 %v1439_v27, %v1818_v10  ;;  %v360_v30 = vpop.f32.mrb[15].mxu1 }
 0x1c3   :  { %v1288_v31 = vmul.f32 -1.442695, %v358_v26  ;;  %v361_v32 = vadd.f32 %v1818_v10, %v360_v30 }
 0x1c4   :  { %1547 = vpow2.f32 %v1290_v28  ;;  %v1291_v33 = vmul.f32 -1.442695, %v369_v29 }
 0x1c5   :  { %1549 = vpow2.f32 %v1288_v31  ;;  %v1289_v34 = vmul.f32 -1.442695, %v361_v32 }
 0x1c6   :  { %v1540_v35 = vpop.eup %1539  ;;  %1551 = vpow2.f32 %v1291_v33 }
 0x1c7   :  { %v1542_v36 = vpop.eup %1541  ;;  %v454_v37 = vadd.f32 1.0, %v1540_v35  ;;  %1553 = vpow2.f32 %v1289_v34  ;;  %v1442_v38 = vpop.f32.mrb[16].mxu1 }
 0x1c8   :  { %v1544_v39 = vpop.eup %1543  ;;  %v452_v40 = vadd.f32 1.0, %v1542_v36  ;;  %v382_v41 = vadd.f32 %v1442_v38, %v1818_v10  ;;  %v373_v42 = vpop.f32.mrb[17].mxu1 }
 0x1c9   :  { %v1546_v43 = vpop.eup %1545  ;;  %1555 = vrcp.f32 %v454_v37  ;;  %v455_v44 = vadd.f32 1.0, %v1544_v39  ;;  %v374_v45 = vadd.f32 %v1818_v10, %v373_v42  ;;  %v1443_v46 = vpop.f32.mrb[18].mxu1 }
 0x1ca   :  { %1557 = vrcp.f32 %v452_v40  ;;  %v453_v47 = vadd.f32 1.0, %v1546_v43  ;;  %v1294_v48 = vmul.f32 -1.442695, %v382_v41  ;;  %v385_v49 = vadd.f32 %v1443_v46, %v1818_v10  ;;  %v376_v50 = vpop.f32.mrb[19].mxu1 }
 0x1cb   :  { %1559 = vrcp.f32 %v455_v44  ;;  %v1292_v51 = vmul.f32 -1.442695, %v374_v45  ;;  %v377_v52 = vadd.f32 %v1818_v10, %v376_v50 }
 0x1cc   :  { %1561 = vrcp.f32 %v453_v47  ;;  %v1295_v53 = vmul.f32 -1.442695, %v385_v49 }
 0x1cd   :  { %1563 = vpow2.f32 %v1294_v48  ;;  %v1293_v54 = vmul.f32 -1.442695, %v377_v52 }
 0x1ce   :  { %v1548_v55 = vpop.eup %1547  ;;  %1565 = vpow2.f32 %v1292_v51 }
 0x1cf   :  { %v1550_v56 = vpop.eup %1549  ;;  %v458_v57 = vadd.f32 1.0, %v1548_v55  ;;  %1567 = vpow2.f32 %v1295_v53  ;;  %v1446_v58 = vpop.f32.mrb[20].mxu1 }
 0x1d0   :  { %v1552_v59 = vpop.eup %1551  ;;  %v456_v60 = vadd.f32 1.0, %v1550_v56  ;;  %1569 = vpow2.f32 %v1293_v54  ;;  %v398_v61 = vadd.f32 %v1446_v58, %v1818_v10  ;;  %v389_v62 = vpop.f32.mrb[21].mxu1 }
 0x1d1   :  { %v1554_v63 = vpop.eup %1553  ;;  %1571 = vrcp.f32 %v458_v57  ;;  %v459_v0 = vadd.f32 1.0, %v1552_v59  ;;  %v1447_v1 = vpop.f32.mrb[22].mxu1  ;;  %v390_v25 = vadd.f32 %v1818_v10, %v389_v62 }
 0x1d2   :  { %1573 = vrcp.f32 %v456_v60  ;;  %v457_v2 = vadd.f32 1.0, %v1554_v63  ;;  %v1298_v3 = vmul.f32 -1.442695, %v398_v61  ;;  %v392_v4 = vpop.f32.mrb[23].mxu1  ;;  %v401_v28 = vadd.f32 %v1447_v1, %v1818_v10 }
 0x1d3   :  { %v1556_v5 = vpop.eup %1555  ;;  %1575 = vrcp.f32 %v459_v0  ;;  %v393_v31 = vadd.f32 %v1818_v10, %v392_v4  ;;  %v1296_v37 = vmul.f32 -1.442695, %v390_v25 }
 0x1d4   :  { %v1558_v6 = vpop.eup %1557  ;;  %v504_v7 = vmul.f32 1.442695, %v1556_v5  ;;  %1577 = vrcp.f32 %v457_v2  ;;  %v1299_v41 = vmul.f32 -1.442695, %v401_v28 }
 0x1d5   :  { %v1560_v8 = vpop.eup %1559  ;;  %v500_v9 = vmul.f32 1.442695, %v1558_v6  ;;  %1579 = vpow2.f32 %v1298_v3  ;;  %v1297_v43 = vmul.f32 -1.442695, %v393_v31 }
 0x1d6   :  { %v1562_v11 = vpop.eup %1561  ;;  %1581 = vpow2.f32 %v504_v7  ;;  %v506_v12 = vmul.f32 1.442695, %v1560_v8  ;;  %v534_v13 = vpack.c.bf16 %v1560_v8, %v1556_v5 }
 0x1d7   :  { %v1564_v14 = vpop.eup %1563  ;;  %1583 = vpow2.f32 %v500_v9  ;;  %v502_v15 = vmul.f32 1.442695, %v1562_v11  ;;  %v533_v16 = vpack.c.bf16 %v1562_v11, %v1558_v6 }
 0x1d8   :  { %v1566_v17 = vpop.eup %1565  ;;  %1585 = vpow2.f32 %v506_v12  ;;  %v462_v18 = vadd.f32 1.0, %v1564_v14 }
 0x1d9   :  { %v1568_v19 = vpop.eup %1567  ;;  %1587 = vpow2.f32 %v502_v15  ;;  %v460_v20 = vadd.f32 1.0, %v1566_v17  ;;  %1450 = vmatprep.mubr.msk.bf16.mxu0 %vm99_vm0, %v533_v16 }
 0x1da   :  { %v1570_v21 = vpop.eup %1569  ;;  %1589 = vrcp.f32 %v462_v18  ;;  %v463_v22 = vadd.f32 1.0, %v1568_v19  ;;  %1451 = vmatmul.mubr.msk.bf16.vlgmr.msra.gmra.mrb[8].mxu0 %vm99_vm0, %v534_v13 }
 0x1db   :  { %v1572_v23 = vpop.eup %1571  ;;  %1591 = vrcp.f32 %v460_v20  ;;  %v461_v24 = vadd.f32 1.0, %v1570_v21  ;;  %v1534_v20 = vld [vmem:[%s2090_s5 + $0x18] sm:$0xff]   ;;  %v1535_v21 = vld [vmem:[%s2092_s6] sm:$0xff]  }
 0x1dc   :  { %v1574_v26 = vpop.eup %1573  ;;  %v512_v27 = vmul.f32 1.442695, %v1572_v23  ;;  %1593 = vrcp.f32 %v463_v22  ;;  %1472 = vmatprep.subr.bf16.mxu1 %v1534_v20  ;;  %v1536_v22 = vld [vmem:[%s2092_s6 + $0x8] sm:$0xff]   ;;  %1490 = vmatprep.subr.bf16.mxu0 %v1535_v21 }
 0x1dd   :  { %v1576_v29 = vpop.eup %1575  ;;  %v508_v30 = vmul.f32 1.442695, %v1574_v26  ;;  %1595 = vrcp.f32 %v461_v24  ;;  %1473 = vmatpush3.bf16.msra.mxu1 %v1534_v20  ;;  %1491 = vmatpush3.bf16.msra.mxu0 %v1535_v21  ;;  %v1923_v24 = vld [vmem:[%s2093_s1] sm:$0xff] }
 0x1de   :  { %v1578_v32 = vpop.eup %1577  ;;  %1597 = vpow2.f32 %v512_v27  ;;  %v514_v33 = vmul.f32 1.442695, %v1576_v29  ;;  %v536_v34 = vpack.c.bf16 %v1576_v29, %v1572_v23  ;;  %1492 = vmatprep.subr.bf16.mxu0 %v1536_v22  ;;  %v1537_v23 = vld [vmem:[%s2092_s6 + $0x10] sm:$0xff]  }
 0x1df   :  { %v1580_v35 = vpop.eup %1579  ;;  %1599 = vpow2.f32 %v508_v30  ;;  %v510_v36 = vmul.f32 1.442695, %v1578_v32  ;;  %v535_v38 = vpack.c.bf16 %v1578_v32, %v1574_v26  ;;  %v1928_v26 = vld [vmem:[%s2088_s7 + $0x2] ss:$0 sm:$0xff] }
 0x1e0   :  { %v1582_v39 = vpop.eup %1581  ;;  %1601 = vpow2.f32 %v514_v33  ;;  %v466_v40 = vadd.f32 1.0, %v1580_v35 }
 0x1e1   :  { %v1584_v42 = vpop.eup %1583  ;;  %1603 = vpow2.f32 %v510_v36  ;;  %1454 = vmatprep.mubr.msk.bf16.mxu0 %vm99_vm0, %v535_v38  ;;  %1154 = vst.msk [vmem:[%s2091_s8 + $0x10] sm:$0xff] %vm1151_vm2, %v1582_v39  ;;  %1493 = vmatpush3.bf16.msra.mxu0 %v1536_v22 }
 0x1e2   :  { %v1586_v10 = vpop.eup %1585  ;;  %1605 = vrcp.f32 %v466_v40  ;;  %1455 = vmatmul.mubr.msk.bf16.gmra.mrb[12].mxu0 %vm99_vm0, %v536_v34  ;;  %1152 = vst.msk [vmem:[%s2091_s8] sm:$0xff] %vm1151_vm2, %v1584_v42  ;;  %1494 = vmatprep.subr.bf16.mxu0 %v1537_v23 }
 0x1e3   :  { %v1588_v44 = vpop.eup %1587  ;;  %1607 = vpow2.f32 %v1296_v37  ;;  %1155 = vst.msk [vmem:[%s2091_s8 + $0x18] sm:$0xff] %vm1151_vm2, %v1586_v10 }
 0x1e4   :  { %v1590_v45 = vpop.eup %1589  ;;  %1609 = vpow2.f32 %v1299_v41  ;;  %1153 = vst.msk [vmem:[%s2091_s8 + $0x8] sm:$0xff] %vm1151_vm2, %v1588_v44 }
 0x1e5   :  { %v1592_v46 = vpop.eup %1591  ;;  %v520_v47 = vmul.f32 1.442695, %v1590_v45  ;;  %1611 = vpow2.f32 %v1297_v43  ;;  %1495 = vmatpush3.bf16.msra.mxu0 %v1537_v23 }
 0x1e6   :  { %v1594_v48 = vpop.eup %1593  ;;  %v516_v49 = vmul.f32 1.442695, %v1592_v46 }
 0x1e7   :  { %v1596_v50 = vpop.eup %1595  ;;  %1613 = vpow2.f32 %v520_v47  ;;  %v522_v51 = vmul.f32 1.442695, %v1594_v48  ;;  %v538_v52 = vpack.c.bf16 %v1594_v48, %v1590_v45 }
 0x1e8   :  { %v1598_v53 = vpop.eup %1597  ;;  %1615 = vpow2.f32 %v516_v49  ;;  %v518_v54 = vmul.f32 1.442695, %v1596_v50  ;;  %v537_v55 = vpack.c.bf16 %v1596_v50, %v1592_v46 }
 0x1e9   :  { %v1600_v56 = vpop.eup %1599  ;;  %1617 = vpow2.f32 %v522_v51  ;;  %1158 = vst.msk [vmem:[%s2091_s8 + $0x30] sm:$0xff] %vm1151_vm2, %v1598_v53 }
 0x1ea   :  { %v1602_v57 = vpop.eup %1601  ;;  %1619 = vpow2.f32 %v518_v54  ;;  %1458 = vmatprep.mubr.msk.bf16.mxu0 %vm99_vm0, %v537_v55  ;;  %1156 = vst.msk [vmem:[%s2091_s8 + $0x20] sm:$0xff] %vm1151_vm2, %v1600_v56 }
 0x1eb   :  { %v1604_v58 = vpop.eup %1603  ;;  %1459 = vmatmul.mubr.msk.bf16.gmra.mrb[16].mxu0 %vm99_vm0, %v538_v52  ;;  %1159 = vst.msk [vmem:[%s2091_s8 + $0x38] sm:$0xff] %vm1151_vm2, %v1602_v57 }
 0x1ec   :  { %v1606_v59 = vpop.eup %1605  ;;  %1157 = vst.msk [vmem:[%s2091_s8 + $0x28] sm:$0xff] %vm1151_vm2, %v1604_v58 }
 0x1ed   :  { %v1608_v60 = vpop.eup %1607  ;;  %v528_v61 = vmul.f32 1.442695, %v1606_v59 }
 0x1ee   :  { %v1610_v62 = vpop.eup %1609  ;;  %v464_v63 = vadd.f32 1.0, %v1608_v60 }
 0x1ef   :  { %v1612_v0 = vpop.eup %1611  ;;  %1621 = vpow2.f32 %v528_v61  ;;  %v467_v1 = vadd.f32 1.0, %v1610_v62 }
 0x1f0   :  { %1623 = vrcp.f32 %v464_v63  ;;  %v465_v2 = vadd.f32 1.0, %v1612_v0 }
 0x1f1   :  { %v1614_v3 = vpop.eup %1613  ;;  %1625 = vrcp.f32 %v467_v1 }
 0x1f2   :  { %v1616_v4 = vpop.eup %1615  ;;  %1627 = vrcp.f32 %v465_v2  ;;  %1162 = vst.msk [vmem:[%s2091_s8 + $0x50] sm:$0xff] %vm1151_vm2, %v1614_v3 }
 0x1f3   :  { %v1618_v5 = vpop.eup %1617  ;;  %1160 = vst.msk [vmem:[%s2091_s8 + $0x40] sm:$0xff] %vm1151_vm2, %v1616_v4 }
 0x1f4   :  { %v1620_v6 = vpop.eup %1619  ;;  %1163 = vst.msk [vmem:[%s2091_s8 + $0x58] sm:$0xff] %vm1151_vm2, %v1618_v5 }
 0x1f5   :  { %1161 = vst.msk [vmem:[%s2091_s8 + $0x48] sm:$0xff] %vm1151_vm2, %v1620_v6 }
 0x1f9   :  { %v1622_v7 = vpop.eup %1621 }
 0x1fa   :  { %v1624_v8 = vpop.eup %1623  ;;  %1166 = vst.msk [vmem:[%s2091_s8 + $0x70] sm:$0xff] %vm1151_vm2, %v1622_v7 }
 0x1fb   :  { %v1626_v9 = vpop.eup %1625  ;;  %v524_v11 = vmul.f32 1.442695, %v1624_v8 }
 0x1fc   :  { %v1628_v12 = vpop.eup %1627  ;;  %v530_v13 = vmul.f32 1.442695, %v1626_v9  ;;  %v540_v14 = vpack.c.bf16 %v1626_v9, %v1606_v59 }
 0x1fd   :  { %1629 = vpow2.f32 %v524_v11  ;;  %v526_v15 = vmul.f32 1.442695, %v1628_v12  ;;  %v539_v16 = vpack.c.bf16 %v1628_v12, %v1624_v8 }
 0x1fe   :  { %1631 = vpow2.f32 %v530_v13 }
 0x1ff   :  { %1633 = vpow2.f32 %v526_v15  ;;  %1462 = vmatprep.mubr.msk.bf16.mxu0 %vm99_vm0, %v539_v16 }
 0x200   :  { %1463 = vmatmul.mubr.msk.bf16.gmra.mrb[20].mxu0 %vm99_vm0, %v540_v14 }
 0x207   :  { %v1630_v17 = vpop.eup %1629 }
 0x208   :  { %v1632_v18 = vpop.eup %1631  ;;  %1164 = vst.msk [vmem:[%s2091_s8 + $0x60] sm:$0xff] %vm1151_vm2, %v1630_v17 }
 0x209   :  { %v1634_v19 = vpop.eup %1633  ;;  %1167 = vst.msk [vmem:[%s2091_s8 + $0x78] sm:$0xff] %vm1151_vm2, %v1632_v18 }
 0x20a   :  { %1165 = vst.msk [vmem:[%s2091_s8 + $0x68] sm:$0xff] %vm1151_vm2, %v1634_v19 }
 0x2ad   :  { %v1452_v25 = vpop.f32.mrb[8].mxu0 }
 0x2ae   :  { %v616_v27 = vadd.f32 %v1452_v25, %v1923_v24  ;;  %v607_v28 = vpop.f32.mrb[9].mxu0 }
 0x2af   :  { %v608_v29 = vadd.f32 %v607_v28, %v1923_v24  ;;  %v1453_v30 = vpop.f32.mrb[10].mxu0 }
 0x2b0   :  { %v677_v31 = vadd.f32 %v1928_v26, %v616_v27  ;;  %v619_v32 = vadd.f32 %v1453_v30, %v1923_v24  ;;  %v610_v33 = vpop.f32.mrb[11].mxu0 }
 0x2b1   :  { %v675_v34 = vadd.f32 %v1928_v26, %v608_v29  ;;  %v611_v35 = vadd.f32 %v610_v33, %v1923_v24 }
 0x2b2   :  { %v678_v36 = vadd.f32 %v1928_v26, %v619_v32  ;;  %v693_v38 = vmax.f32 %v677_v31, 0.0 }
 0x2b3   :  { %v676_v37 = vadd.f32 %v1928_v26, %v611_v35  ;;  %v691_v40 = vmax.f32 %v675_v34, 0.0 }
 0x2b4   :  { %v694_v39 = vmax.f32 %v678_v36, 0.0  ;;  %v1538_v36 = vld [vmem:[%s2092_s6 + $0x18] sm:$0xff]  }
 0x2b5   :  { %v692_v41 = vmax.f32 %v676_v37, 0.0  ;;  %v1456_v42 = vpop.f32.mrb[12].mxu0  ;;  %1496 = vmatprep.subr.bf16.mxu0 %v1538_v36 }
 0x2b6   :  { %v708_v43 = vpack.c.bf16 %v694_v39, %v693_v38  ;;  %v632_v10 = vadd.f32 %v1456_v42, %v1923_v24  ;;  %v623_v44 = vpop.f32.mrb[13].mxu0  ;;  %1497 = vmatpush3.bf16.msra.mxu0 %v1538_v36 }
 0x2b7   :  { %v707_v45 = vpack.c.bf16 %v692_v41, %v691_v40  ;;  %v624_v46 = vadd.f32 %v623_v44, %v1923_v24  ;;  %v1457_v47 = vpop.f32.mrb[14].mxu0 }
 0x2b8   :  { %v681_v48 = vadd.f32 %v1928_v26, %v632_v10  ;;  %v635_v49 = vadd.f32 %v1457_v47, %v1923_v24  ;;  %v626_v50 = vpop.f32.mrb[15].mxu0 }
 0x2b9   :  { %v679_v51 = vadd.f32 %v1928_v26, %v624_v46  ;;  %v627_v52 = vadd.f32 %v626_v50, %v1923_v24  ;;  %1474 = vmatprep.mubr.msk.bf16.mxu1 %vm282_vm1, %v707_v45 }
 0x2ba   :  { %v682_v53 = vadd.f32 %v1928_v26, %v635_v49  ;;  %1475 = vmatmul.mubr.msk.bf16.vlgmr.msra.gmra.mrb[24].mxu1 %vm282_vm1, %v708_v43  ;;  %v697_v55 = vmax.f32 %v681_v48, 0.0 }
 0x2bb   :  { %v680_v54 = vadd.f32 %v1928_v26, %v627_v52  ;;  %v695_v57 = vmax.f32 %v679_v51, 0.0 }
 0x2bc   :  { %v698_v56 = vmax.f32 %v682_v53, 0.0 }
 0x2bd   :  { %v696_v58 = vmax.f32 %v680_v54, 0.0 }
 0x2be   :  { %v710_v59 = vpack.c.bf16 %v698_v56, %v697_v55  ;;  %v1460_v60 = vpop.f32.mrb[16].mxu0 }
 0x2bf   :  { %v709_v61 = vpack.c.bf16 %v696_v58, %v695_v57  ;;  %v648_v62 = vadd.f32 %v1460_v60, %v1923_v24  ;;  %v639_v63 = vpop.f32.mrb[17].mxu0 }
 0x2c0   :  { %v640_v0 = vadd.f32 %v639_v63, %v1923_v24  ;;  %v1461_v1 = vpop.f32.mrb[18].mxu0 }
 0x2c1   :  { %v685_v2 = vadd.f32 %v1928_v26, %v648_v62  ;;  %v651_v3 = vadd.f32 %v1461_v1, %v1923_v24  ;;  %v642_v4 = vpop.f32.mrb[19].mxu0  ;;  %1478 = vmatprep.mubr.msk.bf16.mxu1 %vm282_vm1, %v709_v61 }
 0x2c2   :  { %v683_v5 = vadd.f32 %v1928_v26, %v640_v0  ;;  %v643_v6 = vadd.f32 %v642_v4, %v1923_v24  ;;  %1479 = vmatmul.mubr.msk.bf16.gmra.mrb[28].mxu1 %vm282_vm1, %v710_v59 }
 0x2c3   :  { %v686_v7 = vadd.f32 %v1928_v26, %v651_v3  ;;  %v701_v9 = vmax.f32 %v685_v2, 0.0 }
 0x2c4   :  { %v684_v8 = vadd.f32 %v1928_v26, %v643_v6  ;;  %v699_v12 = vmax.f32 %v683_v5, 0.0 }
 0x2c5   :  { %v702_v11 = vmax.f32 %v686_v7, 0.0 }
 0x2c6   :  { %v700_v13 = vmax.f32 %v684_v8, 0.0 }
 0x2c7   :  { %v712_v14 = vpack.c.bf16 %v702_v11, %v701_v9 }
 0x2c8   :  { %v711_v15 = vpack.c.bf16 %v700_v13, %v699_v12 }
 0x2ca   :  { %1482 = vmatprep.mubr.msk.bf16.mxu1 %vm282_vm1, %v711_v15 }
 0x2cb   :  { %1483 = vmatmul.mubr.msk.bf16.gmra.mrb[32].mxu1 %vm282_vm1, %v712_v14 }
 0x2d3   :  { %v1464_v16 = vpop.f32.mrb[20].mxu0 }
 0x2d4   :  { %v664_v17 = vadd.f32 %v1464_v16, %v1923_v24  ;;  %v655_v18 = vpop.f32.mrb[21].mxu0 }
 0x2d5   :  { %v656_v19 = vadd.f32 %v655_v18, %v1923_v24  ;;  %v1465_v20 = vpop.f32.mrb[22].mxu0 }
 0x2d6   :  { %v689_v21 = vadd.f32 %v1928_v26, %v664_v17  ;;  %v667_v22 = vadd.f32 %v1465_v20, %v1923_v24  ;;  %v658_v23 = vpop.f32.mrb[23].mxu0 }
 0x2d7   :  { %v687_v25 = vadd.f32 %v1928_v26, %v656_v19  ;;  %v659_v27 = vadd.f32 %v658_v23, %v1923_v24  ;;  %v1310_v24 = vld [vmem:[%s2088_s7 + $0x3] ss:$0 sm:$0xff] }
 0x2d8   :  { %v690_v28 = vadd.f32 %v1928_v26, %v667_v22  ;;  %v705_v30 = vmax.f32 %v689_v21, 0.0 }
 0x2d9   :  { %v688_v29 = vadd.f32 %v1928_v26, %v659_v27  ;;  %v703_v32 = vmax.f32 %v687_v25, 0.0 }
 0x2da   :  { %v706_v31 = vmax.f32 %v690_v28, 0.0 }
 0x2db   :  { %v704_v33 = vmax.f32 %v688_v29, 0.0 }
 0x2dc   :  { %v714_v34 = vpack.c.bf16 %v706_v31, %v705_v30  ;;  %v1987_v30 = vld [vmem:[%s2088_s7 + $0x4] ss:$0 sm:$0xff]  ;;  %s1699_s7 = smov 1  }
 0x2dd   :  { %v713_v35 = vpack.c.bf16 %v704_v33, %v703_v32 }
 0x2df   :  { %1486 = vmatprep.mubr.msk.bf16.mxu1 %vm282_vm1, %v713_v35 }
 0x2e0   :  { %1487 = vmatmul.mubr.msk.bf16.gmra.mrb[36].mxu1 %vm282_vm1, %v714_v34 }
 0x38d   :  { %v1476_v26 = vpop.f32.mrb[24].mxu1 }
 0x38e   :  { %v819_v37 = vadd.f32 %v1476_v26, %v1310_v24  ;;  %v810_v38 = vpop.f32.mrb[25].mxu1 }
 0x38f   :  { %v811_v39 = vadd.f32 %v1310_v24, %v810_v38  ;;  %v1477_v40 = vpop.f32.mrb[26].mxu1 }
 0x390   :  { %v822_v41 = vadd.f32 %v1477_v40, %v1310_v24  ;;  %v813_v42 = vpop.f32.mrb[27].mxu1  ;;  %v875_v10 = vmax.f32 %v819_v37, 0.0 }
 0x391   :  { %v814_v43 = vadd.f32 %v1310_v24, %v813_v42  ;;  %v873_v45 = vmax.f32 %v811_v39, 0.0 }
 0x392   :  { %v876_v44 = vmax.f32 %v822_v41, 0.0 }
 0x393   :  { %v874_v46 = vmax.f32 %v814_v43, 0.0 }
 0x394   :  { %v890_v47 = vpack.c.bf16 %v876_v44, %v875_v10 }
 0x395   :  { %v889_v48 = vpack.c.bf16 %v874_v46, %v873_v45  ;;  %v1480_v49 = vpop.f32.mrb[28].mxu1 }
 0x396   :  { %v835_v50 = vadd.f32 %v1480_v49, %v1310_v24  ;;  %v826_v51 = vpop.f32.mrb[29].mxu1 }
 0x397   :  { %v827_v52 = vadd.f32 %v1310_v24, %v826_v51  ;;  %v1481_v53 = vpop.f32.mrb[30].mxu1  ;;  %1498 = vmatprep.mubr.msk.bf16.mxu0 %vm282_vm1, %v889_v48 }
 0x398   :  { %v838_v54 = vadd.f32 %v1481_v53, %v1310_v24  ;;  %v829_v55 = vpop.f32.mrb[31].mxu1  ;;  %1499 = vmatmul.mubr.msk.bf16.vlgmr.msra.gmra.mrb[24].mxu0 %vm282_vm1, %v890_v47  ;;  %v879_v57 = vmax.f32 %v835_v50, 0.0 }
 0x399   :  { %v830_v56 = vadd.f32 %v1310_v24, %v829_v55  ;;  %v877_v59 = vmax.f32 %v827_v52, 0.0 }
 0x39a   :  { %v880_v58 = vmax.f32 %v838_v54, 0.0 }
 0x39b   :  { %v878_v60 = vmax.f32 %v830_v56, 0.0 }
 0x39c   :  { %v892_v61 = vpack.c.bf16 %v880_v58, %v879_v57 }
 0x39d   :  { %v891_v62 = vpack.c.bf16 %v878_v60, %v877_v59 }
 0x39e   :  { %v1484_v63 = vpop.f32.mrb[32].mxu1 }
 0x39f   :  { %v851_v0 = vadd.f32 %v1484_v63, %v1310_v24  ;;  %v842_v1 = vpop.f32.mrb[33].mxu1  ;;  %1502 = vmatprep.mubr.msk.bf16.mxu0 %vm282_vm1, %v891_v62 }
 0x3a0   :  { %v843_v2 = vadd.f32 %v1310_v24, %v842_v1  ;;  %v1485_v3 = vpop.f32.mrb[34].mxu1  ;;  %1503 = vmatmul.mubr.msk.bf16.gmra.mrb[28].mxu0 %vm282_vm1, %v892_v61 }
 0x3a1   :  { %v854_v4 = vadd.f32 %v1485_v3, %v1310_v24  ;;  %v845_v5 = vpop.f32.mrb[35].mxu1  ;;  %v883_v7 = vmax.f32 %v851_v0, 0.0 }
 0x3a2   :  { %v846_v6 = vadd.f32 %v1310_v24, %v845_v5  ;;  %v881_v9 = vmax.f32 %v843_v2, 0.0 }
 0x3a3   :  { %v884_v8 = vmax.f32 %v854_v4, 0.0 }
 0x3a4   :  { %v882_v11 = vmax.f32 %v846_v6, 0.0 }
 0x3a5   :  { %v894_v12 = vpack.c.bf16 %v884_v8, %v883_v7 }
 0x3a6   :  { %v893_v13 = vpack.c.bf16 %v882_v11, %v881_v9 }
 0x3a8   :  { %1506 = vmatprep.mubr.msk.bf16.mxu0 %vm282_vm1, %v893_v13 }
 0x3a9   :  { %1507 = vmatmul.mubr.msk.bf16.gmra.mrb[32].mxu0 %vm282_vm1, %v894_v12 }
 0x3b3   :  { %v1488_v14 = vpop.f32.mrb[36].mxu1 }
 0x3b4   :  { %v867_v15 = vadd.f32 %v1488_v14, %v1310_v24  ;;  %v858_v16 = vpop.f32.mrb[37].mxu1 }
 0x3b5   :  { %v859_v17 = vadd.f32 %v1310_v24, %v858_v16  ;;  %v1489_v18 = vpop.f32.mrb[38].mxu1 }
 0x3b6   :  { %v870_v19 = vadd.f32 %v1489_v18, %v1310_v24  ;;  %v861_v20 = vpop.f32.mrb[39].mxu1  ;;  %v887_v22 = vmax.f32 %v867_v15, 0.0 }
 0x3b7   :  { %v862_v21 = vadd.f32 %v1310_v24, %v861_v20  ;;  %v885_v25 = vmax.f32 %v859_v17, 0.0 }
 0x3b8   :  { %v888_v23 = vmax.f32 %v870_v19, 0.0 }
 0x3b9   :  { %v886_v27 = vmax.f32 %v862_v21, 0.0 }
 0x3ba   :  { %v896_v28 = vpack.c.bf16 %v888_v23, %v887_v22 }
 0x3bb   :  { %v895_v29 = vpack.c.bf16 %v886_v27, %v885_v25 }
 0x3bd   :  { %1510 = vmatprep.mubr.msk.bf16.mxu0 %vm282_vm1, %v895_v29 }
 0x3be   :  { %1511 = vmatmul.mubr.msk.bf16.gmra.mrb[36].mxu0 %vm282_vm1, %v896_v28 }
 0x46b   :  { %v1500_v31 = vpop.f32.mrb[24].mxu0 }
 0x46c   :  { %v1001_v32 = vadd.f32 %v1500_v31, %v1987_v30  ;;  %v992_v33 = vpop.f32.mrb[25].mxu0 }
 0x46d   :  { %v993_v34 = vadd.f32 %v1987_v30, %v992_v33  ;;  %v1501_v35 = vpop.f32.mrb[26].mxu0 }
 0x46e   :  { %v1338_v36 = vmul.f32 -1.442695, %v1001_v32  ;;  %v1004_v24 = vadd.f32 %v1501_v35, %v1987_v30  ;;  %v995_v26 = vpop.f32.mrb[27].mxu0 }
 0x46f   :  { %v1336_v37 = vmul.f32 -1.442695, %v993_v34  ;;  %v996_v38 = vadd.f32 %v1987_v30, %v995_v26 }
 0x470   :  { %1635 = vpow2.f32 %v1338_v36  ;;  %v1339_v39 = vmul.f32 -1.442695, %v1004_v24 }
 0x471   :  { %1637 = vpow2.f32 %v1336_v37  ;;  %v1337_v40 = vmul.f32 -1.442695, %v996_v38 }
 0x472   :  { %1639 = vpow2.f32 %v1339_v39 }
 0x473   :  { %1641 = vpow2.f32 %v1337_v40  ;;  %v1504_v41 = vpop.f32.mrb[28].mxu0 }
 0x474   :  { %v1017_v42 = vadd.f32 %v1504_v41, %v1987_v30  ;;  %v1008_v43 = vpop.f32.mrb[29].mxu0 }
 0x475   :  { %v1009_v10 = vadd.f32 %v1987_v30, %v1008_v43  ;;  %v1505_v44 = vpop.f32.mrb[30].mxu0 }
 0x476   :  { %v1342_v45 = vmul.f32 -1.442695, %v1017_v42  ;;  %v1020_v46 = vadd.f32 %v1505_v44, %v1987_v30  ;;  %v1011_v47 = vpop.f32.mrb[31].mxu0 }
 0x477   :  { %v1340_v48 = vmul.f32 -1.442695, %v1009_v10  ;;  %v1012_v49 = vadd.f32 %v1987_v30, %v1011_v47 }
 0x478   :  { %1643 = vpow2.f32 %v1342_v45  ;;  %v1343_v50 = vmul.f32 -1.442695, %v1020_v46 }
 0x479   :  { %1645 = vpow2.f32 %v1340_v48  ;;  %v1341_v51 = vmul.f32 -1.442695, %v1012_v49 }
 0x47a   :  { %v1636_v52 = vpop.eup %1635  ;;  %1647 = vpow2.f32 %v1343_v50 }
 0x47b   :  { %v1638_v53 = vpop.eup %1637  ;;  %v1105_v54 = vadd.f32 1.0, %v1636_v52  ;;  %1649 = vpow2.f32 %v1341_v51 }
 0x47c   :  { %v1640_v55 = vpop.eup %1639  ;;  %v1103_v56 = vadd.f32 1.0, %v1638_v53  ;;  %v1508_v57 = vpop.f32.mrb[32].mxu0 }
 0x47d   :  { %v1642_v58 = vpop.eup %1641  ;;  %1651 = vrcp.f32 %v1105_v54  ;;  %v1106_v59 = vadd.f32 1.0, %v1640_v55  ;;  %v1033_v60 = vadd.f32 %v1508_v57, %v1987_v30  ;;  %v1024_v61 = vpop.f32.mrb[33].mxu0 }
 0x47e   :  { %1653 = vrcp.f32 %v1103_v56  ;;  %v1104_v62 = vadd.f32 1.0, %v1642_v58  ;;  %v1025_v63 = vadd.f32 %v1987_v30, %v1024_v61  ;;  %v1509_v0 = vpop.f32.mrb[34].mxu0 }
 0x47f   :  { %1655 = vrcp.f32 %v1106_v59  ;;  %v1346_v1 = vmul.f32 -1.442695, %v1033_v60  ;;  %v1036_v2 = vadd.f32 %v1509_v0, %v1987_v30  ;;  %v1027_v3 = vpop.f32.mrb[35].mxu0 }
 0x480   :  { %1657 = vrcp.f32 %v1104_v62  ;;  %v1344_v4 = vmul.f32 -1.442695, %v1025_v63  ;;  %v1028_v5 = vadd.f32 %v1987_v30, %v1027_v3 }
 0x481   :  { %1659 = vpow2.f32 %v1346_v1  ;;  %v1347_v6 = vmul.f32 -1.442695, %v1036_v2 }
 0x482   :  { %v1644_v7 = vpop.eup %1643  ;;  %1661 = vpow2.f32 %v1344_v4  ;;  %v1345_v8 = vmul.f32 -1.442695, %v1028_v5 }
 0x483   :  { %v1646_v9 = vpop.eup %1645  ;;  %v1109_v11 = vadd.f32 1.0, %v1644_v7  ;;  %1663 = vpow2.f32 %v1347_v6 }
 0x484   :  { %v1648_v12 = vpop.eup %1647  ;;  %1665 = vpow2.f32 %v1345_v8  ;;  %v1107_v15 = vadd.f32 1.0, %v1646_v9 }
 0x485   :  { %v1650_v13 = vpop.eup %1649  ;;  %1667 = vrcp.f32 %v1109_v11  ;;  %v1110_v14 = vadd.f32 1.0, %v1648_v12 }
 0x486   :  { %v1108_v17 = vadd.f32 1.0, %v1650_v13 }
 0x487   :  { %v1652_v16 = vpop.eup %1651  ;;  %1669 = vrcp.f32 %v1110_v14 }
 0x488   :  { %v1654_v18 = vpop.eup %1653  ;;  %1188 = vrot.lane.b32.xlu1 %v1652_v16, %s1699_s7  ;;  %1671 = vrcp.f32 %v1107_v15 }
 0x489   :  { %v1656_v19 = vpop.eup %1655  ;;  %1184 = vrot.lane.b32.xlu0 %v1654_v18, %s1699_s7  ;;  %1673 = vrcp.f32 %v1108_v17 }
 0x48a   :  { %v1658_v20 = vpop.eup %1657 }
 0x48b   :  { %v1660_v21 = vpop.eup %1659 }
 0x48c   :  { %v1662_v22 = vpop.eup %1661  ;;  %v1113_v23 = vadd.f32 1.0, %v1660_v21  ;;  %1190 = vrot.lane.b32.xlu1 %v1656_v19, %s1699_s7 }
 0x48d   :  { %v1664_v25 = vpop.eup %1663  ;;  %1186 = vrot.lane.b32.xlu0 %v1658_v20, %s1699_s7  ;;  %v1111_v28 = vadd.f32 1.0, %v1662_v22 }
 0x48e   :  { %v1666_v27 = vpop.eup %1665  ;;  %1675 = vrcp.f32 %v1113_v23  ;;  %v1114_v29 = vadd.f32 1.0, %v1664_v25 }
 0x48f   :  { %v1668_v31 = vpop.eup %1667  ;;  %v1112_v32 = vadd.f32 1.0, %v1666_v27 }
 0x490   :  { %1677 = vrcp.f32 %v1114_v29 }
 0x491   :  { %v1670_v33 = vpop.eup %1669  ;;  %v1512_v34 = vpop.f32.mrb[36].mxu0  ;;  %1196 = vrot.lane.b32.xlu0 %v1668_v31, %s1699_s7  ;;  %1679 = vrcp.f32 %v1111_v28 }
 0x492   :  { %v1049_v35 = vadd.f32 %v1512_v34, %v1987_v30  ;;  %v1040_v36 = vpop.f32.mrb[37].mxu0  ;;  %1198 = vrot.lane.b32.xlu1 %v1670_v33, %s1699_s7  ;;  %v1672_v37 = vpop.eup %1671  ;;  %1681 = vrcp.f32 %v1112_v32 }
 0x493   :  { %v1041_v24 = vadd.f32 %v1987_v30, %v1040_v36  ;;  %v1513_v26 = vpop.f32.mrb[38].mxu0  ;;  %v1674_v41 = vpop.eup %1673 }
 0x494   :  { %v1350_v38 = vmul.f32 -1.442695, %v1049_v35  ;;  %v1052_v39 = vadd.f32 %v1513_v26, %v1987_v30  ;;  %v1043_v40 = vpop.f32.mrb[39].mxu0 }
 0x495   :  { %v1348_v42 = vmul.f32 -1.442695, %v1041_v24  ;;  %v1044_v43 = vadd.f32 %v1987_v30, %v1043_v40  ;;  %1192 = vrot.lane.b32.xlu0 %v1672_v37, %s1699_s7 }
 0x496   :  { %1683 = vpow2.f32 %v1350_v38  ;;  %v1351_v10 = vmul.f32 -1.442695, %v1052_v39  ;;  %1194 = vrot.lane.b32.xlu1 %v1674_v41, %s1699_s7 }
 0x497   :  { %1685 = vpow2.f32 %v1348_v42  ;;  %v1349_v44 = vmul.f32 -1.442695, %v1044_v43 }
 0x498   :  { %v1676_v45 = vpop.eup %1675  ;;  %1687 = vpow2.f32 %v1351_v10 }
 0x499   :  { %1689 = vpow2.f32 %v1349_v44  ;;  %1204 = vrot.lane.b32.xlu0 %v1676_v45, %s1699_s7 }
 0x49a   :  { %v1678_v46 = vpop.eup %1677 }
 0x49b   :  { %1206 = vrot.lane.b32.xlu1 %v1678_v46, %s1699_s7  ;;  %v1680_v47 = vpop.eup %1679 }
 0x49c   :  { %v1682_v30 = vpop.eup %1681 }
 0x49d   :  { %1200 = vrot.lane.b32.xlu0 %v1680_v47, %s1699_s7 }
 0x49f   :  { %1202 = vrot.lane.b32.xlu1 %v1682_v30, %s1699_s7 }
 0x4a0   :  { %v1684_v48 = vpop.eup %1683 }
 0x4a1   :  { %v1686_v49 = vpop.eup %1685  ;;  %v1117_v53 = vadd.f32 1.0, %v1684_v48 }
 0x4a2   :  { %v1688_v50 = vpop.eup %1687  ;;  %v1115_v51 = vadd.f32 1.0, %v1686_v49 }
 0x4a3   :  { %v1690_v52 = vpop.eup %1689  ;;  %v1118_v55 = vadd.f32 1.0, %v1688_v50 }
 0x4a4   :  { %1691 = vrcp.f32 %v1115_v51  ;;  %v1116_v54 = vadd.f32 1.0, %v1690_v52 }
 0x4a6   :  { %1693 = vrcp.f32 %v1116_v54 }
 0x4a7   :  { %1695 = vrcp.f32 %v1117_v53 }
 0x4a8   :  { %1697 = vrcp.f32 %v1118_v55 }
 0x4ae   :  { %v1692_v56 = vpop.eup %1691 }
 0x4af   :  { %1208 = vrot.lane.b32.xlu0 %v1692_v56, %s1699_s7 }
 0x4b0   :  { %v1694_v57 = vpop.eup %1693 }
 0x4b1   :  { %1210 = vrot.lane.b32.xlu1 %v1694_v57, %s1699_s7  ;;  %v1696_v58 = vpop.eup %1695 }
 0x4b2   :  { %v1698_v59 = vpop.eup %1697 }
 0x4b3   :  { %1212 = vrot.lane.b32.xlu0 %v1696_v58, %s1699_s7 }
 0x4b5   :  { %1214 = vrot.lane.b32.xlu1 %v1698_v59, %s1699_s7 }
 0x4fa   :  { %v1189_v60 = vpop.permute.xlu1 %1188 }
 0x4fb   :  { %1235 = vst.msk [vmem:[%s2091_s8 + $0x10] sm:$0xff] %vm1232_vm3, %v1189_v60  ;;  %v1185_v61 = vpop.permute.xlu0 %1184 }
 0x4fc   :  { %1233 = vst.msk [vmem:[%s2091_s8] sm:$0xff] %vm1232_vm3, %v1185_v61 }
 0x4fe   :  { %v1191_v62 = vpop.permute.xlu1 %1190 }
 0x4ff   :  { %1236 = vst.msk [vmem:[%s2091_s8 + $0x18] sm:$0xff] %vm1232_vm3, %v1191_v62  ;;  %v1187_v63 = vpop.permute.xlu0 %1186 }
 0x500   :  { %1234 = vst.msk [vmem:[%s2091_s8 + $0x8] sm:$0xff] %vm1232_vm3, %v1187_v63 }
 0x503   :  { %v1197_v0 = vpop.permute.xlu0 %1196 }
 0x504   :  { %1239 = vst.msk [vmem:[%s2091_s8 + $0x30] sm:$0xff] %vm1232_vm3, %v1197_v0  ;;  %v1199_v1 = vpop.permute.xlu1 %1198 }
 0x505   :  { %1240 = vst.msk [vmem:[%s2091_s8 + $0x38] sm:$0xff] %vm1232_vm3, %v1199_v1 }
 0x507   :  { %v1193_v2 = vpop.permute.xlu0 %1192 }
 0x508   :  { %1237 = vst.msk [vmem:[%s2091_s8 + $0x20] sm:$0xff] %vm1232_vm3, %v1193_v2  ;;  %v1195_v3 = vpop.permute.xlu1 %1194 }
 0x509   :  { %1238 = vst.msk [vmem:[%s2091_s8 + $0x28] sm:$0xff] %vm1232_vm3, %v1195_v3 }
 0x50b   :  { %v1205_v4 = vpop.permute.xlu0 %1204 }
 0x50c   :  { %1243 = vst.msk [vmem:[%s2091_s8 + $0x50] sm:$0xff] %vm1232_vm3, %v1205_v4 }
 0x50d   :  { %v1207_v5 = vpop.permute.xlu1 %1206 }
 0x50e   :  { %1244 = vst.msk [vmem:[%s2091_s8 + $0x58] sm:$0xff] %vm1232_vm3, %v1207_v5 }
 0x50f   :  { %v1201_v6 = vpop.permute.xlu0 %1200 }
 0x510   :  { %1241 = vst.msk [vmem:[%s2091_s8 + $0x40] sm:$0xff] %vm1232_vm3, %v1201_v6 }
 0x511   :  { %v1203_v7 = vpop.permute.xlu1 %1202 }
 0x512   :  { %1242 = vst.msk [vmem:[%s2091_s8 + $0x48] sm:$0xff] %vm1232_vm3, %v1203_v7 }
 0x521   :  { %v1209_v8 = vpop.permute.xlu0 %1208 }
 0x522   :  { %1245 = vst.msk [vmem:[%s2091_s8 + $0x60] sm:$0xff] %vm1232_vm3, %v1209_v8 }
 0x523   :  { %v1211_v9 = vpop.permute.xlu1 %1210 }
 0x524   :  { %1246 = vst.msk [vmem:[%s2091_s8 + $0x68] sm:$0xff] %vm1232_vm3, %v1211_v9 }
 0x525   :  { %v1213_v11 = vpop.permute.xlu0 %1212 }
 0x526   :  { %1247 = vst.msk [vmem:[%s2091_s8 + $0x70] sm:$0xff] %vm1232_vm3, %v1213_v11 }
 0x527   :  { %v1215_v12 = vpop.permute.xlu1 %1214 }
 0x528   :  { %1248 = vst.msk [vmem:[%s2091_s8 + $0x78] sm:$0xff] %vm1232_vm3, %v1215_v12 }

</bundles_post_ra>
